<compile_context>
chip_gen: v7x
topology: tpu7x:2x2x1
jax: 0.10.0
libtpu: 0.0.40
codegen_flags: <defaults>
</compile_context>

<pallas_src>
import functools

import jax
import jax.numpy as jnp
from jax.experimental import pallas as pl
from jax.experimental.pallas import tpu as pltpu


def _hm_class_sum_kernel(bank_ref, lab_ref, csum_ref, *, cpad):
    """One grid step: scatter-add a (tn, F) bank tile into (cpad, F) sums."""
    k = pl.program_id(1)  # reduction step within this split

    @pl.when(k == 0)
    def _():
        csum_ref[...] = jnp.zeros_like(csum_ref)

    tn = bank_ref.shape[0]
    lab = lab_ref[...]                                            # (1, tn) i32
    class_ids = jax.lax.broadcasted_iota(jnp.int32, (cpad, tn), 0)
    # bf16 one-hot (0/1 exact in bf16); lane-major labels broadcast along
    # sublanes against the per-sublane class iota.
    onehot = (lab == class_ids).astype(jnp.bfloat16)              # (cpad, tn)

    # Full-MXU-height bf16 matmul, f32 accumulation into the resident slab.
    csum_ref[...] += jnp.dot(onehot, bank_ref[...],
                             preferred_element_type=jnp.float32)


def _tpu_generation():
    """(vmem_capacity_bytes, num_tensorcores, is_v7x) with safe fallbacks."""
    kind = ""
    try:
        kind = (jax.devices()[0].device_kind or "").lower()
    except Exception:
        pass
    is_v7x = "v7" in kind
    vmem_cap = (64 << 20) if is_v7x else (128 << 20)
    n_cores = 2 if is_v7x else 1
    try:
        info_cap = int(pltpu.get_tpu_info().vmem_capacity_bytes)
        if info_cap > (1 << 20):
            vmem_cap = info_cap
    except Exception:
        pass
    if is_v7x:
        vmem_cap = min(vmem_cap, 64 << 20)   # per-TC VMEM on v7x
    return vmem_cap, n_cores, is_v7x


def _choose_tile(per_split_rows, feat_dim, cpad, itemsize, bank_buffers,
                 vmem_budget_bytes):
    """Largest tn (multiple of 128, dividing per_split_rows) whose true
    per-tile VMEM footprint (bank buffers + padded labels + one-hot + iota
    temporaries) fits the budget."""
    # tn-independent bytes: resident (cpad, F) f32 accumulator (x2) + slack.
    fixed = 2 * cpad * feat_dim * 4 + (2 << 20)
    # Bytes that scale with tn (one "row" = one bank sample):
    per_row = (bank_buffers * feat_dim * itemsize   # streamed bank tiles
               + 2 * 8 * 4                          # (1,tn) labels pads to (8,tn) i32, x2 bufs
               + cpad * itemsize                    # (cpad, tn) bf16 one-hot
               + cpad * 4)                          # (cpad, tn) i32 iota / compare temps
    avail = max(vmem_budget_bytes - fixed, 1 << 20)
    tn = (avail // per_row) // 128 * 128
    tn = int(max(128, min(tn, per_split_rows)))
    while per_split_rows % tn:
        tn -= 128
    return tn


def hybrid_memory_forward(x, features_bank, labels, indexes, *, temp=0.05,
                          num_classes=None, compute_dtype=jnp.bfloat16,
                          num_splits=None):
    """Pallas forward of HybridMemory. Returns scalar loss (f32).

    `features_bank` is the persistent (N, F) memory bank; for best
    performance it should already be stored in `compute_dtype` (bf16) in its
    natural (N, F) layout so no per-call cast/transpose pass over HBM occurs.
    """
    B, Fdim = x.shape
    N, Fdim2 = features_bank.shape
    assert Fdim == Fdim2
    assert N % 128 == 0, "num_samples must be a multiple of 128"
    C = int(num_classes)
    cpad = ((C + 127) // 128) * 128     # sublane/lane-dense class axis

    vmem_cap, n_cores, is_v7x = _tpu_generation()
    # ~48 MiB scoped cap on v7x (64 MiB physical), ~96 MiB on v5e/v6e (128 MiB).
    vmem_soft_cap = max(16 << 20, int(0.75 * vmem_cap))
    bank_buffers = 3 if is_v7x else 2

    # Leading 'parallel' split of the sample axis = number of TensorCores
    # (megacore on v7x; a single split on 1-TC v5e/v6e keeps the full tile
    # pool and avoids an extra partial writeback).
    if num_splits is None:
        num_splits = n_cores
    if N % (num_splits * 128) != 0:
        num_splits = 1
    per_split = N // num_splits

    itemsize = jnp.dtype(compute_dtype).itemsize
    # One-time cast only if the persistent bank is not already stored in the
    # streamed dtype; layout is natural (N, F) -- no transpose.
    bank = (features_bank if features_bank.dtype == compute_dtype
            else features_bank.astype(compute_dtype))
    labels_row = labels.astype(jnp.int32).reshape(1, N)   # lane-major labels

    tn = _choose_tile(per_split, Fdim, cpad, itemsize, bank_buffers,
                      vmem_soft_cap)
    steps = per_split // tn

    # Scoped-VMEM limit from the same true-footprint terms as _choose_tile.
    need = (bank_buffers * tn * Fdim * itemsize
            + 2 * 8 * tn * 4
            + cpad * tn * (itemsize + 4)
            + 2 * cpad * Fdim * 4
            + (4 << 20))
    vmem_limit = int(min(vmem_soft_cap, max(16 << 20, need)))

    kernel = functools.partial(_hm_class_sum_kernel, cpad=cpad)

    bank_spec_kwargs = {}
    if bank_buffers > 2:
        bank_spec_kwargs["pipeline_mode"] = pl.Buffered(bank_buffers)

    partial_csums = pl.pallas_call(
        kernel,
        out_shape=jax.ShapeDtypeStruct((num_splits, cpad, Fdim), jnp.float32),
        grid_spec=pltpu.PrefetchScalarGridSpec(
            num_scalar_prefetch=0,
            grid=(num_splits, steps),
            in_specs=[
                # memory bank tile (tn, F), streamed in natural (N, F) layout
                pl.BlockSpec((tn, Fdim), lambda s, k: (s * steps + k, 0),
                             **bank_spec_kwargs),
                # labels tile (1, tn), lane-major
                pl.BlockSpec((1, tn), lambda s, k: (0, s * steps + k)),
            ],
            # one partial (cpad, F) slab per split; constant across the
            # reduction axis k -> resident VMEM accumulator.
            out_specs=pl.BlockSpec((None, cpad, Fdim), lambda s, k: (s, 0, 0)),
        ),
        compiler_params=pltpu.CompilerParams(
            dimension_semantics=("parallel", "arbitrary"),
            vmem_limit_bytes=vmem_limit),
    )(bank, labels_row)

    # ---- tiny finalize in plain JAX (O(N) + O(B*cpad*F)) -------------------
    csum = partial_csums.sum(axis=0)                          # (cpad, F) f32
    nums = jnp.zeros((cpad,), jnp.float32).at[labels].add(1.0)
    mask = (nums > 0).astype(jnp.float32)
    denom = mask * nums + (1.0 - mask)
    class_mean = csum / denom[:, None]                        # (cpad, F)

    # sim[b, c] = x[b] . class_mean[c] / temp  -- linear, so identical to
    # summing per-sample logits first, as the PyTorch code does.
    sim = jnp.dot(x.astype(jnp.float32), class_mean.T,
                  precision=jax.lax.Precision.HIGHEST) * (1.0 / temp)
    # Faithful to the PyTorch code: no max-subtraction before exp. Safe as
    # long as inputs/features are L2-normalized (|sim| <= 1/temp).
    exps = jnp.exp(sim) * mask[None, :]
    masked_sim = exps / (exps.sum(axis=1, keepdims=True) + 1e-6)
    logp = jnp.log(masked_sim + 1e-6)
    targets = labels[indexes]
    return -jnp.mean(logp[jnp.arange(B), targets])


def reference_forward(x, features, labels, indexes, *, temp, num_classes):
    """Pure-JAX transcription of the PyTorch forward (for validation)."""
    B = x.shape[0]
    logits = jnp.dot(x, features.T,
                     precision=jax.lax.Precision.HIGHEST) / temp      # (B, N)
    # sim.index_add_(0, labels, logits.t())
    sim = jnp.zeros((num_classes, B), jnp.float32).at[labels].add(logits.T)
    nums = jnp.zeros((num_classes,), jnp.float32).at[labels].add(1.0)
    mask = (nums > 0).astype(jnp.float32)
    sim = sim / (mask * nums + (1.0 - mask))[:, None]
    exps = jnp.exp(sim.T) * mask[None, :]
    masked_sim = exps / (exps.sum(axis=1, keepdims=True) + 1e-6)
    targets = labels[indexes]
    logp = jnp.log(masked_sim + 1e-6)
    return -jnp.mean(logp[jnp.arange(B), targets])


if __name__ == "__main__":
    # Module hyper-params implied by __init__: features buffer is
    # (num_samples, num_features), labels[-1] is (num_samples,) int.
    # Zero-init buffers are degenerate, so use unit-norm random features and
    # random labels from PRNGKey(0).
    B, num_features, num_samples, source_classes = 8, 64, 512, 5
    temp = 0.05

    key = jax.random.PRNGKey(0)
    k1, k2, k3, k4 = jax.random.split(key, 4)
    x = jax.random.normal(k1, (B, num_features), jnp.float32)
    x = x / jnp.linalg.norm(x, axis=1, keepdims=True)
    features = jax.random.normal(k2, (num_samples, num_features), jnp.float32)
    features = features / jnp.linalg.norm(features, axis=1, keepdims=True)
    labels = jax.random.randint(k3, (num_samples,), 0, source_classes, jnp.int32)
    indexes = jax.random.randint(k4, (B,), 0, num_samples, jnp.int32)

    # Persistent memory bank stored once in the streamed dtype/layout
    # (natural (N, F), bf16) -- no per-call transpose/cast pass over HBM.
    bank = features.astype(jnp.bfloat16)

    loss = hybrid_memory_forward(x, bank, labels, indexes,
                                 temp=temp, num_classes=source_classes)
    loss = jax.block_until_ready(loss)

    # Validate against a reference fed the same bf16-quantized bank (isolates
    # kernel numerics from the deliberate bf16 storage), plus a loose sanity
    # check against the exact f32 reference.
    fq = features.astype(jnp.bfloat16).astype(jnp.float32)
    ref_q = reference_forward(x, fq, labels, indexes,
                              temp=temp, num_classes=source_classes)
    ref_f32 = reference_forward(x, features, labels, indexes,
                                temp=temp, num_classes=source_classes)

    assert jnp.isfinite(loss), "kernel produced non-finite loss"
    assert abs(float(loss) - float(ref_q)) < 1e-2, (float(loss), float(ref_q))
    assert abs(float(loss) - float(ref_f32)) < 0.15, (float(loss), float(ref_f32))
    print("KERNEL_OK")
</pallas_src>

<mosaic_0001>
module attributes {stable_mosaic.version = 11 : i64} {
  func.func @_hm_class_sum_kernel(%arg0: i32, %arg1: i32, %arg2: memref<512x64xbf16, #tpu.memory_space<vmem>>, %arg3: memref<1x512xi32, #tpu.memory_space<vmem>>, %arg4: memref<1x128x64xf32, #tpu.memory_space<vmem>>) attributes {dimension_semantics = [#tpu.dimension_semantics<parallel>, #tpu.dimension_semantics<arbitrary>], iteration_bounds = array<i64: 1, 1>, scalar_prefetch = 0 : i64, scratch_operands = 0 : i64, tpu.core_type = #tpu.core_type<tc>, window_params = [{transform_indices = @transform_0, window_bounds = array<i64: 512, 64>}, {transform_indices = @transform_1, window_bounds = array<i64: 1, 512>}, {transform_indices = @transform_2, window_bounds = array<i64: 1, 128, 64>}]} {
    %c0_i32 = arith.constant 0 : i32
    %0 = arith.cmpi eq, %arg1, %c0_i32 : i32
    %1 = arith.extui %0 : i1 to i32
    %c0_i32_0 = arith.constant 0 : i32
    %2 = arith.cmpi ne, %1, %c0_i32_0 : i32
    scf.if %2 {
      %cst_10 = arith.constant 0.000000e+00 : f32
      %18 = vector.broadcast %cst_10 : f32 to vector<128x64xf32>
      %c0_11 = arith.constant 0 : index
      %c0_12 = arith.constant 0 : index
      %c0_13 = arith.constant 0 : index
      %19 = vector.load %arg4[%c0_11, %c0_12, %c0_13] : memref<1x128x64xf32, #tpu.memory_space<vmem>>, vector<1x128x64xf32>
      %20 = vector.shape_cast %19 : vector<1x128x64xf32> to vector<128x64xf32>
      %21 = vector.shape_cast %18 : vector<128x64xf32> to vector<1x128x64xf32>
      tpu.vector_store %arg4[%c0_11, %c0_12, %c0_13], %21 {strides = array<i32>} : memref<1x128x64xf32, #tpu.memory_space<vmem>>, vector<1x128x64xf32>,
    } else {
    }
    %c0 = arith.constant 0 : index
    %c0_1 = arith.constant 0 : index
    %3 = vector.load %arg3[%c0, %c0_1] : memref<1x512xi32, #tpu.memory_space<vmem>>, vector<1x512xi32>
    %4 = tpu.iota {dimensions = array<i32: 0>} : vector<128x512xi32>
    %5 = vector.broadcast %3 : vector<1x512xi32> to vector<128x512xi32>
    %6 = arith.cmpi eq, %5, %4 : vector<128x512xi32>
    %7 = arith.extui %6 : vector<128x512xi1> to vector<128x512xi32>
    %8 = arith.sitofp %7 : vector<128x512xi32> to vector<128x512xf32>
    %9 = arith.truncf %8 : vector<128x512xf32> to vector<128x512xbf16>
    %c0_2 = arith.constant 0 : index
    %c0_3 = arith.constant 0 : index
    %c0_4 = arith.constant 0 : index
    %10 = vector.load %arg4[%c0_2, %c0_3, %c0_4] : memref<1x128x64xf32, #tpu.memory_space<vmem>>, vector<1x128x64xf32>
    %11 = vector.shape_cast %10 : vector<1x128x64xf32> to vector<128x64xf32>
    %c0_5 = arith.constant 0 : index
    %c0_6 = arith.constant 0 : index
    %12 = vector.load %arg2[%c0_5, %c0_6] : memref<512x64xbf16, #tpu.memory_space<vmem>>, vector<512x64xbf16>
    %cst = arith.constant dense<0.000000e+00> : vector<128x64xf32>
    %13 = tpu.matmul %9, %12, %cst {dimension_numbers = #tpu.dot_dimension_numbers<[1], [0], [0], [1], [0, 0, 1, 1], [], []>} : vector<128x512xbf16>, vector<512x64xbf16>, vector<128x64xf32> -> vector<128x64xf32>
    %14 = arith.addf %11, %13 : vector<128x64xf32>
    %c0_7 = arith.constant 0 : index
    %c0_8 = arith.constant 0 : index
    %c0_9 = arith.constant 0 : index
    %15 = vector.load %arg4[%c0_7, %c0_8, %c0_9] : memref<1x128x64xf32, #tpu.memory_space<vmem>>, vector<1x128x64xf32>
    %16 = vector.shape_cast %15 : vector<1x128x64xf32> to vector<128x64xf32>
    %17 = vector.shape_cast %14 : vector<128x64xf32> to vector<1x128x64xf32>
    tpu.vector_store %arg4[%c0_7, %c0_8, %c0_9], %17 {strides = array<i32>} : memref<1x128x64xf32, #tpu.memory_space<vmem>>, vector<1x128x64xf32>,
    return
  }
  func.func @transform_0(%arg0: i32, %arg1: i32) -> (i32, i32) {
    %c1_i32 = arith.constant 1 : i32
    %0 = arith.muli %arg0, %c1_i32 : i32
    %1 = arith.addi %0, %arg1 : i32
    %c0_i32 = arith.constant 0 : i32
    %c0_i32_0 = arith.constant 0 : i32
    return %1, %c0_i32 : i32, i32
  }
  func.func @transform_1(%arg0: i32, %arg1: i32) -> (i32, i32) {
    %c1_i32 = arith.constant 1 : i32
    %0 = arith.muli %arg0, %c1_i32 : i32
    %1 = arith.addi %0, %arg1 : i32
    %c0_i32 = arith.constant 0 : i32
    %c0_i32_0 = arith.constant 0 : i32
    return %c0_i32, %1 : i32, i32
  }
  func.func @transform_2(%arg0: i32, %arg1: i32) -> (i32, i32, i32) {
    %c0_i32 = arith.constant 0 : i32
    %c0_i32_0 = arith.constant 0 : i32
    %c0_i32_1 = arith.constant 0 : i32
    return %arg0, %c0_i32, %c0_i32_0 : i32, i32, i32
  }
}

</mosaic_0001>

<bundles_post_ra>
// kernel: tpu_custom_call.1
= control target key start
LH: loop header
LB: loop body
LE: loop exit
PB: predicated region body
PF: predicated region fallthrough
CT: control target
= control target key end

     0   :  { %v75_v19 = vlaneseq  ;;  %v1166_v46 = vmov 1.0|1.0   ;;  %v1167_v59 = vmov 0.0   ;;  %s1587_s0 = inlined_call_operand.vmem [shape: bf16[512,64], index: 0, kind: input, shape index: {}]   ;;  %s1588_s1 = inlined_call_operand.vmem [shape: s32[1,512], index: 1, kind: input, shape index: {}]   ;;  %s1589_s2 = inlined_call_operand.vmem [shape: f32[1,128,64], index: 2, kind: output, shape index: {}]  }
   0x1   :  { %v1134_v0 = vld [vmem:[%s1587_s0 + $0x40] sm:$0xff]   ;;  %v1138_v4 = vld [vmem:[%s1587_s0 + $0x48] sm:$0xff]   ;;  %v1142_v8 = vld [vmem:[%s1587_s0 + $0x50] sm:$0xff]  }
   0x2   :  { %v1135_v1 = vld [vmem:[%s1587_s0 + $0xc0] sm:$0xff]   ;;  %1004 = vmatprep.subr.bf16.mxu0 %v1134_v0  ;;  %v1139_v5 = vld [vmem:[%s1587_s0 + $0xc8] sm:$0xff]   ;;  %v1143_v9 = vld [vmem:[%s1587_s0 + $0xd0] sm:$0xff]   ;;  %v1252_v24 = vshrl.u32 %v75_v19, 7 }
   0x3   :  { %v1136_v2 = vld [vmem:[%s1587_s0] sm:$0xff]   ;;  %1068 = vmatprep.subr.bf16.mxu1 %v1135_v1  ;;  %v1140_v6 = vld [vmem:[%s1587_s0 + $0x8] sm:$0xff]   ;;  %v1144_v10 = vld [vmem:[%s1587_s0 + $0x10] sm:$0xff]  }
   0x4   :  { %v1137_v3 = vld [vmem:[%s1587_s0 + $0x80] sm:$0xff]   ;;  %1005 = vmatpush3.bf16.msra.mxu0 %v1136_v2  ;;  %v1141_v7 = vld [vmem:[%s1587_s0 + $0x88] sm:$0xff]   ;;  %v1145_v11 = vld [vmem:[%s1587_s0 + $0x90] sm:$0xff]   ;;  %v98_v29 = vsub.s32 1, %v1252_v24  ;;  %v106_v31 = vsub.s32 3, %v1252_v24  ;;  %v94_v33 = vsub.s32 0, %v1252_v24 }
   0x5   :  { %1069 = vmatpush3.bf16.msra.mxu1 %v1137_v3  ;;  %1006 = vmatprep.subr.bf16.mxu0 %v1138_v4  ;;  %v1146_v12 = vld [vmem:[%s1587_s0 + $0x58] sm:$0xff]   ;;  %v1150_v16 = vld [vmem:[%s1587_s0 + $0x60] sm:$0xff]   ;;  %v1154_v21 = vld [vmem:[%s1587_s0 + $0x68] sm:$0xff]   ;;  %v102_v35 = vsub.s32 2, %v1252_v24  ;;  %v77_v38 = vadd.s32 8, %v1252_v24  ;;  %v78_v40 = vadd.s32 16, %v1252_v24 }
   0x6   :  { %1070 = vmatprep.subr.bf16.mxu1 %v1139_v5  ;;  %v1147_v13 = vld [vmem:[%s1587_s0 + $0xd8] sm:$0xff]   ;;  %v1151_v17 = vld [vmem:[%s1587_s0 + $0xe0] sm:$0xff]   ;;  %v1155_v22 = vld [vmem:[%s1587_s0 + $0xe8] sm:$0xff]   ;;  %v79_v41 = vadd.s32 24, %v1252_v24  ;;  %v80_v47 = vadd.s32 32, %v1252_v24  ;;  %v81_v48 = vadd.s32 40, %v1252_v24 }
   0x7   :  { %v1148_v14 = vld [vmem:[%s1587_s0 + $0x18] sm:$0xff]   ;;  %v1152_v18 = vld [vmem:[%s1587_s0 + $0x20] sm:$0xff]   ;;  %v1156_v23 = vld [vmem:[%s1587_s0 + $0x28] sm:$0xff]   ;;  %v82_v49 = vadd.s32 48, %v1252_v24  ;;  %v83_v50 = vadd.s32 56, %v1252_v24  ;;  %v84_v51 = vadd.s32 64, %v1252_v24 }
   0x8   :  { %1007 = vmatpush3.bf16.msra.mxu0 %v1140_v6  ;;  %v1149_v15 = vld [vmem:[%s1587_s0 + $0x98] sm:$0xff]   ;;  %v1153_v20 = vld [vmem:[%s1587_s0 + $0xa0] sm:$0xff]   ;;  %v1157_v25 = vld [vmem:[%s1587_s0 + $0xa8] sm:$0xff]   ;;  %v85_v52 = vadd.s32 72, %v1252_v24  ;;  %v86_v53 = vadd.s32 80, %v1252_v24  ;;  %v87_v54 = vadd.s32 88, %v1252_v24 }
   0x9   :  { %1071 = vmatpush3.bf16.msra.mxu1 %v1141_v7  ;;  %1008 = vmatprep.subr.bf16.mxu0 %v1142_v8  ;;  %v1158_v26 = vld [vmem:[%s1587_s0 + $0x70] sm:$0xff]   ;;  %v1162_v32 = vld [vmem:[%s1587_s0 + $0x78] sm:$0xff]   ;;  %v74_v39 = vld [vmem:[%s1588_s1] sm:$0xf]  ;;  %v88_v55 = vadd.s32 96, %v1252_v24  ;;  %v89_v56 = vadd.s32 104, %v1252_v24 }
   0xa   :  { %1072 = vmatprep.subr.bf16.mxu1 %v1143_v9  ;;  %v1159_v27 = vld [vmem:[%s1587_s0 + $0xf0] sm:$0xff]   ;;  %v1163_v34 = vld [vmem:[%s1587_s0 + $0xf8] sm:$0xff]   ;;  %v1291_v42 = vrot.slane %v74_v39, %v98_v29  ;;  %v1293_v43 = vrot.slane %v74_v39, %v106_v31  ;;  %v1295_v44 = vrot.slane %v74_v39, %v94_v33  ;;  %v1297_v45 = vrot.slane %v74_v39, %v102_v35 }
   0xb   :  { %v1160_v28 = vld [vmem:[%s1587_s0 + $0x30] sm:$0xff]   ;;  %v1164_v36 = vld [vmem:[%s1587_s0 + $0x38] sm:$0xff]   ;;  %v90_v57 = vadd.s32 112, %v1252_v24  ;;  %v91_v58 = vadd.s32 120, %v1252_v24 }
   0xc   :  { %1009 = vmatpush3.bf16.msra.mxu0 %v1144_v10  ;;  %v1161_v30 = vld [vmem:[%s1587_s0 + $0xb0] sm:$0xff]   ;;  %v1165_v37 = vld [vmem:[%s1587_s0 + $0xb8] sm:$0xff]   ;;  %vm109_vm0 = vcmp.eq.s32.totalorder %v1291_v42, %v1252_v24  ;;  %vm113_vm1 = vcmp.eq.s32.totalorder %v1291_v42, %v77_v38  ;;  %vm111_vm2 = vcmp.eq.s32.totalorder %v1293_v43, %v1252_v24  ;;  %vm115_vm3 = vcmp.eq.s32.totalorder %v1293_v43, %v77_v38 }
   0xd   :  { %1073 = vmatpush3.bf16.msra.mxu1 %v1145_v11  ;;  %1010 = vmatprep.subr.bf16.mxu0 %v1146_v12  ;;  %vm940_vm4 = vmpackc.low %vm113_vm1, %vm109_vm0  ;;  %vm108_vm5 = vcmp.eq.s32.totalorder %v1295_v44, %v1252_v24  ;;  %vm112_vm6 = vcmp.eq.s32.totalorder %v1295_v44, %v77_v38  ;;  %vm110_vm7 = vcmp.eq.s32.totalorder %v1297_v45, %v1252_v24 }
   0xe   :  { %1074 = vmatprep.subr.bf16.mxu1 %v1147_v13  ;;  %vm114_vm8 = vcmp.eq.s32.totalorder %v1297_v45, %v77_v38  ;;  %941 = vmatprep.mubr.msk.bf16.mxu0 %vm940_vm4, %v1166_v46  ;;  %vm972_vm9 = vmpackc.low %vm115_vm3, %vm111_vm2  ;;  %vm117_vm10 = vcmp.eq.s32.totalorder %v1291_v42, %v78_v40  ;;  %vm121_vm11 = vcmp.eq.s32.totalorder %v1291_v42, %v79_v41 }
   0xf   :  { %973 = vmatprep.mubr.msk.bf16.mxu1 %vm972_vm9, %v1166_v46  ;;  %vm942_vm12 = vmpackc.low %vm112_vm6, %vm108_vm5  ;;  %vm119_vm13 = vcmp.eq.s32.totalorder %v1293_v43, %v78_v40  ;;  %vm123_vm14 = vcmp.eq.s32.totalorder %v1293_v43, %v79_v41  ;;  %vm116_vm1 = vcmp.eq.s32.totalorder %v1295_v44, %v78_v40  ;;  %vm120_vm2 = vcmp.eq.s32.totalorder %v1295_v44, %v79_v41 }
  0x10   :  { %1011 = vmatpush3.bf16.msra.mxu0 %v1148_v14  ;;  %vm974_vm15 = vmpackc.low %vm114_vm8, %vm110_vm7  ;;  %vm118_vm4 = vcmp.eq.s32.totalorder %v1297_v45, %v78_v40  ;;  %vm122_vm5 = vcmp.eq.s32.totalorder %v1297_v45, %v79_v41  ;;  %vm125_vm6 = vcmp.eq.s32.totalorder %v1291_v42, %v80_v47  ;;  %vm129_vm7 = vcmp.eq.s32.totalorder %v1291_v42, %v81_v48 }
  0x11   :  { %1075 = vmatpush3.bf16.msra.mxu1 %v1149_v15  ;;  %1012 = vmatprep.subr.bf16.mxu0 %v1150_v16  ;;  %vm944_vm0 = vmpackc.low %vm121_vm11, %vm117_vm10  ;;  %vm127_vm9 = vcmp.eq.s32.totalorder %v1293_v43, %v80_v47  ;;  %vm131_vm10 = vcmp.eq.s32.totalorder %v1293_v43, %v81_v48 }
  0x12   :  { %1076 = vmatprep.subr.bf16.mxu1 %v1151_v17  ;;  %vm976_vm3 = vmpackc.low %vm123_vm14, %vm119_vm13  ;;  %vm124_vm13 = vcmp.eq.s32.totalorder %v1295_v44, %v80_v47  ;;  %vm128_vm14 = vcmp.eq.s32.totalorder %v1295_v44, %v81_v48 }
  0x13   :  { %vm946_vm8 = vmpackc.low %vm120_vm2, %vm116_vm1  ;;  %vm130_vm1 = vcmp.eq.s32.totalorder %v1297_v45, %v81_v48  ;;  %vm133_vm2 = vcmp.eq.s32.totalorder %v1291_v42, %v82_v49 }
  0x14   :  { %1013 = vmatpush3.bf16.msra.mxu0 %v1152_v18  ;;  %vm978_vm11 = vmpackc.low %vm122_vm5, %vm118_vm4  ;;  %vm135_vm5 = vcmp.eq.s32.totalorder %v1293_v43, %v82_v49 }
  0x15   :  { %1077 = vmatpush3.bf16.msra.mxu1 %v1153_v20  ;;  %1014 = vmatprep.subr.bf16.mxu0 %v1154_v21  ;;  %vm950_vm4 = vmpackc.low %vm128_vm14, %vm124_vm13  ;;  %vm141_vm13 = vcmp.eq.s32.totalorder %v1291_v42, %v84_v51  ;;  %vm145_vm14 = vcmp.eq.s32.totalorder %v1291_v42, %v85_v52 }
  0x16   :  { %1078 = vmatprep.subr.bf16.mxu1 %v1155_v22 }
  0x18   :  { %1015 = vmatpush3.bf16.msra.mxu0 %v1156_v23 }
  0x19   :  { %1079 = vmatpush3.bf16.msra.mxu1 %v1157_v25  ;;  %1016 = vmatprep.subr.bf16.mxu0 %v1158_v26 }
  0x1a   :  { %1080 = vmatprep.subr.bf16.mxu1 %v1159_v27 }
  0x1c   :  { %1017 = vmatpush3.bf16.msra.mxu0 %v1160_v28 }
  0x1d   :  { %1081 = vmatpush3.bf16.msra.mxu1 %v1161_v30  ;;  %1018 = vmatprep.subr.bf16.mxu0 %v1162_v32 }
  0x1e   :  { %1082 = vmatprep.subr.bf16.mxu1 %v1163_v34 }
  0x20   :  { %1019 = vmatpush3.bf16.msra.mxu0 %v1164_v36 }
  0x21   :  { %1083 = vmatpush3.bf16.msra.mxu1 %v1165_v37 }
  0x23   :  { %943 = vmatmul.mubr.msk.bf16.vlgmr.msra.gmra.mrb[0].mxu0 %vm942_vm12, %v1166_v46  ;;  %vm948_vm12 = vmpackc.low %vm129_vm7, %vm125_vm6  ;;  %vm139_vm6 = vcmp.eq.s32.totalorder %v1293_v43, %v83_v50 }
  0x24   :  { %975 = vmatmul.mubr.msk.bf16.vlgmr.msra.gmra.mrb[0].mxu1 %vm974_vm15, %v1166_v46  ;;  %945 = vmatprep.mubr.msk.bf16.mxu0 %vm944_vm0, %v1166_v46  ;;  %vm980_vm15 = vmpackc.low %vm131_vm10, %vm127_vm9  ;;  %vm126_vm0 = vcmp.eq.s32.totalorder %v1297_v45, %v80_v47  ;;  %vm132_vm10 = vcmp.eq.s32.totalorder %v1295_v44, %v82_v49 }
  0x25   :  { %977 = vmatprep.mubr.msk.bf16.mxu1 %vm976_vm3, %v1166_v46  ;;  %vm137_vm3 = vcmp.eq.s32.totalorder %v1291_v42, %v83_v50  ;;  %vm982_vm7 = vmpackc.low %vm130_vm1, %vm126_vm0  ;;  %vm143_vm1 = vcmp.eq.s32.totalorder %v1293_v43, %v84_v51 }
  0x26   :  { %vm984_vm9 = vmpackc.low %vm139_vm6, %vm135_vm5  ;;  %vm140_vm6 = vcmp.eq.s32.totalorder %v1295_v44, %v84_v51 }
  0x2b   :  { %947 = vmatmul.mubr.msk.bf16.gmra.mrb[4].mxu0 %vm946_vm8, %v1166_v46  ;;  %vm952_vm8 = vmpackc.low %vm137_vm3, %vm133_vm2  ;;  %vm147_vm2 = vcmp.eq.s32.totalorder %v1293_v43, %v85_v52 }
  0x2c   :  { %979 = vmatmul.mubr.msk.bf16.gmra.mrb[4].mxu1 %vm978_vm11, %v1166_v46  ;;  %949 = vmatprep.mubr.msk.bf16.mxu0 %vm948_vm12, %v1166_v46  ;;  %vm136_vm11 = vcmp.eq.s32.totalorder %v1295_v44, %v83_v50  ;;  %vm134_vm12 = vcmp.eq.s32.totalorder %v1297_v45, %v82_v49  ;;  %vm988_vm5 = vmpackc.low %vm147_vm2, %vm143_vm1  ;;  %vm148_vm2 = vcmp.eq.s32.totalorder %v1295_v44, %v86_v53 }
  0x2d   :  { %981 = vmatprep.mubr.msk.bf16.mxu1 %vm980_vm15, %v1166_v46  ;;  %vm138_vm15 = vcmp.eq.s32.totalorder %v1297_v45, %v83_v50  ;;  %vm954_vm0 = vmpackc.low %vm136_vm11, %vm132_vm10  ;;  %vm149_vm10 = vcmp.eq.s32.totalorder %v1291_v42, %v86_v53  ;;  %vm153_vm11 = vcmp.eq.s32.totalorder %v1291_v42, %v87_v54 }
  0x2e   :  { %vm986_vm3 = vmpackc.low %vm138_vm15, %vm134_vm12  ;;  %vm151_vm15 = vcmp.eq.s32.totalorder %v1293_v43, %v86_v53 }
  0x33   :  { %951 = vmatmul.mubr.msk.bf16.gmra.mrb[8].mxu0 %vm950_vm4, %v1166_v46  ;;  %vm956_vm4 = vmpackc.low %vm145_vm14, %vm141_vm13  ;;  %vm155_vm13 = vcmp.eq.s32.totalorder %v1293_v43, %v87_v54 }
  0x34   :  { %983 = vmatmul.mubr.msk.bf16.gmra.mrb[8].mxu1 %vm982_vm7, %v1166_v46  ;;  %953 = vmatprep.mubr.msk.bf16.mxu0 %vm952_vm8, %v1166_v46  ;;  %vm144_vm7 = vcmp.eq.s32.totalorder %v1295_v44, %v85_v52  ;;  %vm142_vm8 = vcmp.eq.s32.totalorder %v1297_v45, %v84_v51  ;;  %vm992_vm1 = vmpackc.low %vm155_vm13, %vm151_vm15  ;;  %vm156_vm13 = vcmp.eq.s32.totalorder %v1295_v44, %v88_v55 }
  0x35   :  { %985 = vmatprep.mubr.msk.bf16.mxu1 %vm984_vm9, %v1166_v46  ;;  %vm146_vm9 = vcmp.eq.s32.totalorder %v1297_v45, %v85_v52  ;;  %vm958_vm12 = vmpackc.low %vm144_vm7, %vm140_vm6  ;;  %vm157_vm6 = vcmp.eq.s32.totalorder %v1291_v42, %v88_v55  ;;  %vm161_vm7 = vcmp.eq.s32.totalorder %v1291_v42, %v89_v56 }
  0x36   :  { %vm990_vm14 = vmpackc.low %vm146_vm9, %vm142_vm8  ;;  %vm159_vm9 = vcmp.eq.s32.totalorder %v1293_v43, %v88_v55 }
  0x3b   :  { %955 = vmatmul.mubr.msk.bf16.gmra.mrb[12].mxu0 %vm954_vm0, %v1166_v46  ;;  %vm960_vm0 = vmpackc.low %vm153_vm11, %vm149_vm10  ;;  %vm163_vm10 = vcmp.eq.s32.totalorder %v1293_v43, %v89_v56 }
  0x3c   :  { %987 = vmatmul.mubr.msk.bf16.gmra.mrb[12].mxu1 %vm986_vm3, %v1166_v46  ;;  %957 = vmatprep.mubr.msk.bf16.mxu0 %vm956_vm4, %v1166_v46  ;;  %vm152_vm3 = vcmp.eq.s32.totalorder %v1295_v44, %v87_v54  ;;  %vm150_vm4 = vcmp.eq.s32.totalorder %v1297_v45, %v86_v53  ;;  %vm996_vm15 = vmpackc.low %vm163_vm10, %vm159_vm9  ;;  %vm164_vm10 = vcmp.eq.s32.totalorder %v1295_v44, %v90_v57 }
  0x3d   :  { %989 = vmatprep.mubr.msk.bf16.mxu1 %vm988_vm5, %v1166_v46  ;;  %vm154_vm5 = vcmp.eq.s32.totalorder %v1297_v45, %v87_v54  ;;  %vm962_vm8 = vmpackc.low %vm152_vm3, %vm148_vm2  ;;  %vm165_vm2 = vcmp.eq.s32.totalorder %v1291_v42, %v90_v57  ;;  %vm169_vm3 = vcmp.eq.s32.totalorder %v1291_v42, %v91_v58 }
  0x3e   :  { %vm994_vm11 = vmpackc.low %vm154_vm5, %vm150_vm4  ;;  %vm167_vm5 = vcmp.eq.s32.totalorder %v1293_v43, %v90_v57 }
  0x43   :  { %959 = vmatmul.mubr.msk.bf16.gmra.mrb[16].mxu0 %vm958_vm12, %v1166_v46  ;;  %vm964_vm12 = vmpackc.low %vm161_vm7, %vm157_vm6  ;;  %vm171_vm6 = vcmp.eq.s32.totalorder %v1293_v43, %v91_v58 }
  0x44   :  { %991 = vmatmul.mubr.msk.bf16.gmra.mrb[16].mxu1 %vm990_vm14, %v1166_v46  ;;  %961 = vmatprep.mubr.msk.bf16.mxu0 %vm960_vm0, %v1166_v46  ;;  %vm160_vm14 = vcmp.eq.s32.totalorder %v1295_v44, %v89_v56  ;;  %vm158_vm0 = vcmp.eq.s32.totalorder %v1297_v45, %v88_v55  ;;  %vm1000_vm9 = vmpackc.low %vm171_vm6, %vm167_vm5 }
  0x45   :  { %993 = vmatprep.mubr.msk.bf16.mxu1 %vm992_vm1, %v1166_v46  ;;  %vm162_vm1 = vcmp.eq.s32.totalorder %v1297_v45, %v89_v56  ;;  %vm966_vm4 = vmpackc.low %vm160_vm14, %vm156_vm13 }
  0x46   :  { %vm998_vm7 = vmpackc.low %vm162_vm1, %vm158_vm0  ;;  %vm57_vm0 = vcmask 523264  }
  0x47   :  { %58 = vst.msk [vmem:[%s1589_s2] sm:$0xff] %vm57_vm0, %v1167_v59  ;;  %59 = vst.msk [vmem:[%s1589_s2 + $0x8] sm:$0xff] %vm57_vm0, %v1167_v59 }
  0x48   :  { %60 = vst.msk [vmem:[%s1589_s2 + $0x10] sm:$0xff] %vm57_vm0, %v1167_v59  ;;  %61 = vst.msk [vmem:[%s1589_s2 + $0x18] sm:$0xff] %vm57_vm0, %v1167_v59 }
  0x49   :  { %62 = vst.msk [vmem:[%s1589_s2 + $0x20] sm:$0xff] %vm57_vm0, %v1167_v59  ;;  %63 = vst.msk [vmem:[%s1589_s2 + $0x28] sm:$0xff] %vm57_vm0, %v1167_v59 }
  0x4a   :  { %64 = vst.msk [vmem:[%s1589_s2 + $0x30] sm:$0xff] %vm57_vm0, %v1167_v59  ;;  %65 = vst.msk [vmem:[%s1589_s2 + $0x38] sm:$0xff] %vm57_vm0, %v1167_v59 }
  0x4b   :  { %963 = vmatmul.mubr.msk.bf16.gmra.mrb[20].mxu0 %vm962_vm8, %v1166_v46  ;;  %vm968_vm8 = vmpackc.low %vm169_vm3, %vm165_vm2  ;;  %66 = vst.msk [vmem:[%s1589_s2 + $0x40] sm:$0xff] %vm57_vm0, %v1167_v59 }
  0x4c   :  { %995 = vmatmul.mubr.msk.bf16.gmra.mrb[20].mxu1 %vm994_vm11, %v1166_v46  ;;  %965 = vmatprep.mubr.msk.bf16.mxu0 %vm964_vm12, %v1166_v46  ;;  %vm168_vm11 = vcmp.eq.s32.totalorder %v1295_v44, %v91_v58  ;;  %vm166_vm12 = vcmp.eq.s32.totalorder %v1297_v45, %v90_v57  ;;  %67 = vst.msk [vmem:[%s1589_s2 + $0x48] sm:$0xff] %vm57_vm0, %v1167_v59  ;;  %68 = vst.msk [vmem:[%s1589_s2 + $0x50] sm:$0xff] %vm57_vm0, %v1167_v59 }
  0x4d   :  { %997 = vmatprep.mubr.msk.bf16.mxu1 %vm996_vm15, %v1166_v46  ;;  %vm170_vm15 = vcmp.eq.s32.totalorder %v1297_v45, %v91_v58  ;;  %vm970_vm13 = vmpackc.low %vm168_vm11, %vm164_vm10  ;;  %69 = vst.msk [vmem:[%s1589_s2 + $0x58] sm:$0xff] %vm57_vm0, %v1167_v59 }
  0x4e   :  { %vm1002_vm14 = vmpackc.low %vm170_vm15, %vm166_vm12  ;;  %70 = vst.msk [vmem:[%s1589_s2 + $0x60] sm:$0xff] %vm57_vm0, %v1167_v59  ;;  %v332_v5 = vld [vmem:[%s1589_s2] sm:$0xff]  ;;  %v333_v10 = vld [vmem:[%s1589_s2 + $0x8] sm:$0xff] }
  0x4f   :  { %71 = vst.msk [vmem:[%s1589_s2 + $0x68] sm:$0xff] %vm57_vm0, %v1167_v59  ;;  %72 = vst.msk [vmem:[%s1589_s2 + $0x70] sm:$0xff] %vm57_vm0, %v1167_v59  ;;  %v334_v23 = vld [vmem:[%s1589_s2 + $0x10] sm:$0xff]  ;;  %v335_v28 = vld [vmem:[%s1589_s2 + $0x18] sm:$0xff] }
  0x50   :  { %73 = vst.msk [vmem:[%s1589_s2 + $0x78] sm:$0xff] %vm57_vm0, %v1167_v59  ;;  %v336_v41 = vld [vmem:[%s1589_s2 + $0x20] sm:$0xff] }
  0x51   :  { %v338_v59 = vld [vmem:[%s1589_s2 + $0x30] sm:$0xff] }
  0x53   :  { %967 = vmatmul.mubr.msk.bf16.gmra.mrb[24].mxu0 %vm966_vm4, %v1166_v46 }
  0x54   :  { %999 = vmatmul.mubr.msk.bf16.gmra.mrb[24].mxu1 %vm998_vm7, %v1166_v46  ;;  %969 = vmatprep.mubr.msk.bf16.mxu0 %vm968_vm8, %v1166_v46 }
  0x55   :  { %1001 = vmatprep.mubr.msk.bf16.mxu1 %vm1000_vm9, %v1166_v46 }
  0x5b   :  { %971 = vmatmul.mubr.msk.bf16.gmra.mrb[28].mxu0 %vm970_vm13, %v1166_v46 }
  0x5c   :  { %1003 = vmatmul.mubr.msk.bf16.gmra.mrb[28].mxu1 %vm1002_vm14, %v1166_v46  ;;  %v337_v46 = vld [vmem:[%s1589_s2 + $0x28] sm:$0xff] }
  0xf6   :  { %v1020_v60 = vpop.f32.mrb[0].mxu0 }
  0xf7   :  { %v1084_v61 = vpop.f32.mrb[0].mxu1  ;;  %v1021_v62 = vpop.f32.mrb[1].mxu0 }
  0xf8   :  { %v1022_v63 = vadd.f32 %v1021_v62, %v1020_v60  ;;  %v1085_v0 = vpop.f32.mrb[1].mxu1  ;;  %v1023_v1 = vpop.f32.mrb[2].mxu0 }
  0xf9   :  { %v1086_v2 = vadd.f32 %v1085_v0, %v1084_v61  ;;  %v1087_v3 = vpop.f32.mrb[2].mxu1  ;;  %v1024_v4 = vpop.f32.mrb[3].mxu0  ;;  %v339_v0 = vld [vmem:[%s1589_s2 + $0x38] sm:$0xff] }
  0xfa   :  { %v1025_v6 = vadd.f32 %v1024_v4, %v1023_v1  ;;  %v1088_v7 = vpop.f32.mrb[3].mxu1 }
  0xfb   :  { %v736_v8 = vadd.f32 %v1086_v2, %v1022_v63  ;;  %v1089_v9 = vadd.f32 %v1088_v7, %v1087_v3 }
  0xfd   :  { %v798_v11 = vadd.f32 %v736_v8, %v332_v5  ;;  %v739_v12 = vadd.f32 %v1089_v9, %v1025_v6 }
  0xfe   :  { %v1026_v13 = vpop.f32.mrb[4].mxu0 }
  0xff   :  { %815 = vst.msk [vmem:[%s1589_s2] sm:$0xff] %vm57_vm0, %v798_v11  ;;  %v799_v14 = vadd.f32 %v739_v12, %v333_v10  ;;  %v1090_v15 = vpop.f32.mrb[4].mxu1  ;;  %v1027_v16 = vpop.f32.mrb[5].mxu0 }
 0x100   :  { %v1028_v17 = vadd.f32 %v1027_v16, %v1026_v13  ;;  %v1091_v18 = vpop.f32.mrb[5].mxu1  ;;  %v1029_v19 = vpop.f32.mrb[6].mxu0  ;;  %v340_v13 = vld [vmem:[%s1589_s2 + $0x40] sm:$0xff] }
 0x101   :  { %816 = vst.msk [vmem:[%s1589_s2 + $0x8] sm:$0xff] %vm57_vm0, %v799_v14  ;;  %v1092_v20 = vadd.f32 %v1091_v18, %v1090_v15  ;;  %v1093_v21 = vpop.f32.mrb[6].mxu1  ;;  %v1030_v22 = vpop.f32.mrb[7].mxu0  ;;  %v341_v18 = vld [vmem:[%s1589_s2 + $0x48] sm:$0xff] }
 0x102   :  { %v1031_v24 = vadd.f32 %v1030_v22, %v1029_v19  ;;  %v1094_v25 = vpop.f32.mrb[7].mxu1 }
 0x103   :  { %v744_v26 = vadd.f32 %v1092_v20, %v1028_v17  ;;  %v1095_v27 = vadd.f32 %v1094_v25, %v1093_v21 }
 0x105   :  { %v800_v29 = vadd.f32 %v744_v26, %v334_v23  ;;  %v747_v30 = vadd.f32 %v1095_v27, %v1031_v24 }
 0x106   :  { %v1032_v31 = vpop.f32.mrb[8].mxu0 }
 0x107   :  { %817 = vst.msk [vmem:[%s1589_s2 + $0x10] sm:$0xff] %vm57_vm0, %v800_v29  ;;  %v801_v32 = vadd.f32 %v747_v30, %v335_v28  ;;  %v1096_v33 = vpop.f32.mrb[8].mxu1  ;;  %v1033_v34 = vpop.f32.mrb[9].mxu0 }
 0x108   :  { %v1034_v35 = vadd.f32 %v1033_v34, %v1032_v31  ;;  %v1097_v36 = vpop.f32.mrb[9].mxu1  ;;  %v1035_v37 = vpop.f32.mrb[10].mxu0  ;;  %v342_v31 = vld [vmem:[%s1589_s2 + $0x50] sm:$0xff] }
 0x109   :  { %818 = vst.msk [vmem:[%s1589_s2 + $0x18] sm:$0xff] %vm57_vm0, %v801_v32  ;;  %v1098_v38 = vadd.f32 %v1097_v36, %v1096_v33  ;;  %v1099_v39 = vpop.f32.mrb[10].mxu1  ;;  %v1036_v40 = vpop.f32.mrb[11].mxu0  ;;  %v343_v36 = vld [vmem:[%s1589_s2 + $0x58] sm:$0xff] }
 0x10a   :  { %v1037_v42 = vadd.f32 %v1036_v40, %v1035_v37  ;;  %v1100_v43 = vpop.f32.mrb[11].mxu1 }
 0x10b   :  { %v752_v44 = vadd.f32 %v1098_v38, %v1034_v35  ;;  %v1101_v45 = vadd.f32 %v1100_v43, %v1099_v39 }
 0x10d   :  { %v802_v47 = vadd.f32 %v752_v44, %v336_v41  ;;  %v755_v48 = vadd.f32 %v1101_v45, %v1037_v42 }
 0x10e   :  { %v1038_v49 = vpop.f32.mrb[12].mxu0 }
 0x10f   :  { %819 = vst.msk [vmem:[%s1589_s2 + $0x20] sm:$0xff] %vm57_vm0, %v802_v47  ;;  %v803_v50 = vadd.f32 %v755_v48, %v337_v46  ;;  %v1102_v51 = vpop.f32.mrb[12].mxu1  ;;  %v1039_v52 = vpop.f32.mrb[13].mxu0 }
 0x110   :  { %v1040_v53 = vadd.f32 %v1039_v52, %v1038_v49  ;;  %v1103_v54 = vpop.f32.mrb[13].mxu1  ;;  %v1041_v55 = vpop.f32.mrb[14].mxu0  ;;  %v344_v49 = vld [vmem:[%s1589_s2 + $0x60] sm:$0xff] }
 0x111   :  { %820 = vst.msk [vmem:[%s1589_s2 + $0x28] sm:$0xff] %vm57_vm0, %v803_v50  ;;  %v1104_v56 = vadd.f32 %v1103_v54, %v1102_v51  ;;  %v1105_v57 = vpop.f32.mrb[14].mxu1  ;;  %v1042_v58 = vpop.f32.mrb[15].mxu0  ;;  %v345_v54 = vld [vmem:[%s1589_s2 + $0x68] sm:$0xff] }
 0x112   :  { %v1043_v60 = vadd.f32 %v1042_v58, %v1041_v55  ;;  %v1106_v61 = vpop.f32.mrb[15].mxu1 }
 0x113   :  { %v760_v62 = vadd.f32 %v1104_v56, %v1040_v53  ;;  %v1107_v63 = vadd.f32 %v1106_v61, %v1105_v57 }
 0x115   :  { %v804_v1 = vadd.f32 %v760_v62, %v338_v59  ;;  %v763_v2 = vadd.f32 %v1107_v63, %v1043_v60 }
 0x116   :  { %v1044_v3 = vpop.f32.mrb[16].mxu0 }
 0x117   :  { %821 = vst.msk [vmem:[%s1589_s2 + $0x30] sm:$0xff] %vm57_vm0, %v804_v1  ;;  %v805_v4 = vadd.f32 %v763_v2, %v339_v0  ;;  %v1108_v5 = vpop.f32.mrb[16].mxu1  ;;  %v1045_v6 = vpop.f32.mrb[17].mxu0 }
 0x118   :  { %v1046_v7 = vadd.f32 %v1045_v6, %v1044_v3  ;;  %v1109_v8 = vpop.f32.mrb[17].mxu1  ;;  %v1047_v9 = vpop.f32.mrb[18].mxu0  ;;  %v346_v3 = vld [vmem:[%s1589_s2 + $0x70] sm:$0xff] }
 0x119   :  { %822 = vst.msk [vmem:[%s1589_s2 + $0x38] sm:$0xff] %vm57_vm0, %v805_v4  ;;  %v1110_v10 = vadd.f32 %v1109_v8, %v1108_v5  ;;  %v1111_v11 = vpop.f32.mrb[18].mxu1  ;;  %v1048_v12 = vpop.f32.mrb[19].mxu0  ;;  %v347_v8 = vld [vmem:[%s1589_s2 + $0x78] sm:$0xff] }
 0x11a   :  { %v1049_v14 = vadd.f32 %v1048_v12, %v1047_v9  ;;  %v1112_v15 = vpop.f32.mrb[19].mxu1 }
 0x11b   :  { %v768_v16 = vadd.f32 %v1110_v10, %v1046_v7  ;;  %v1113_v17 = vadd.f32 %v1112_v15, %v1111_v11 }
 0x11d   :  { %v806_v19 = vadd.f32 %v768_v16, %v340_v13  ;;  %v771_v20 = vadd.f32 %v1113_v17, %v1049_v14 }
 0x11e   :  { %v1050_v21 = vpop.f32.mrb[20].mxu0 }
 0x11f   :  { %823 = vst.msk [vmem:[%s1589_s2 + $0x40] sm:$0xff] %vm57_vm0, %v806_v19  ;;  %v807_v22 = vadd.f32 %v771_v20, %v341_v18  ;;  %v1114_v23 = vpop.f32.mrb[20].mxu1  ;;  %v1051_v24 = vpop.f32.mrb[21].mxu0 }
 0x120   :  { %v1052_v25 = vadd.f32 %v1051_v24, %v1050_v21  ;;  %v1115_v26 = vpop.f32.mrb[21].mxu1  ;;  %v1053_v27 = vpop.f32.mrb[22].mxu0 }
 0x121   :  { %824 = vst.msk [vmem:[%s1589_s2 + $0x48] sm:$0xff] %vm57_vm0, %v807_v22  ;;  %v1116_v28 = vadd.f32 %v1115_v26, %v1114_v23  ;;  %v1117_v29 = vpop.f32.mrb[22].mxu1  ;;  %v1054_v30 = vpop.f32.mrb[23].mxu0 }
 0x122   :  { %v1055_v32 = vadd.f32 %v1054_v30, %v1053_v27  ;;  %v1118_v33 = vpop.f32.mrb[23].mxu1 }
 0x123   :  { %v776_v34 = vadd.f32 %v1116_v28, %v1052_v25  ;;  %v1119_v35 = vadd.f32 %v1118_v33, %v1117_v29 }
 0x125   :  { %v808_v37 = vadd.f32 %v776_v34, %v342_v31  ;;  %v779_v38 = vadd.f32 %v1119_v35, %v1055_v32 }
 0x126   :  { %v1056_v39 = vpop.f32.mrb[24].mxu0 }
 0x127   :  { %825 = vst.msk [vmem:[%s1589_s2 + $0x50] sm:$0xff] %vm57_vm0, %v808_v37  ;;  %v809_v40 = vadd.f32 %v779_v38, %v343_v36  ;;  %v1120_v41 = vpop.f32.mrb[24].mxu1  ;;  %v1057_v42 = vpop.f32.mrb[25].mxu0 }
 0x128   :  { %v1058_v43 = vadd.f32 %v1057_v42, %v1056_v39  ;;  %v1121_v44 = vpop.f32.mrb[25].mxu1  ;;  %v1059_v45 = vpop.f32.mrb[26].mxu0 }
 0x129   :  { %826 = vst.msk [vmem:[%s1589_s2 + $0x58] sm:$0xff] %vm57_vm0, %v809_v40  ;;  %v1122_v46 = vadd.f32 %v1121_v44, %v1120_v41  ;;  %v1123_v47 = vpop.f32.mrb[26].mxu1  ;;  %v1060_v48 = vpop.f32.mrb[27].mxu0 }
 0x12a   :  { %v1061_v50 = vadd.f32 %v1060_v48, %v1059_v45  ;;  %v1124_v51 = vpop.f32.mrb[27].mxu1 }
 0x12b   :  { %v784_v52 = vadd.f32 %v1122_v46, %v1058_v43  ;;  %v1125_v53 = vadd.f32 %v1124_v51, %v1123_v47 }
 0x12d   :  { %v810_v55 = vadd.f32 %v784_v52, %v344_v49  ;;  %v787_v56 = vadd.f32 %v1125_v53, %v1061_v50 }
 0x12e   :  { %v1062_v57 = vpop.f32.mrb[28].mxu0 }
 0x12f   :  { %827 = vst.msk [vmem:[%s1589_s2 + $0x60] sm:$0xff] %vm57_vm0, %v810_v55  ;;  %v811_v58 = vadd.f32 %v787_v56, %v345_v54  ;;  %v1126_v59 = vpop.f32.mrb[28].mxu1  ;;  %v1063_v60 = vpop.f32.mrb[29].mxu0 }
 0x130   :  { %v1064_v61 = vadd.f32 %v1063_v60, %v1062_v57  ;;  %v1127_v62 = vpop.f32.mrb[29].mxu1  ;;  %v1065_v63 = vpop.f32.mrb[30].mxu0 }
 0x131   :  { %828 = vst.msk [vmem:[%s1589_s2 + $0x68] sm:$0xff] %vm57_vm0, %v811_v58  ;;  %v1128_v0 = vadd.f32 %v1127_v62, %v1126_v59  ;;  %v1129_v1 = vpop.f32.mrb[30].mxu1  ;;  %v1066_v2 = vpop.f32.mrb[31].mxu0 }
 0x132   :  { %v1067_v4 = vadd.f32 %v1066_v2, %v1065_v63  ;;  %v1130_v5 = vpop.f32.mrb[31].mxu1 }
 0x133   :  { %v792_v6 = vadd.f32 %v1128_v0, %v1064_v61  ;;  %v1131_v7 = vadd.f32 %v1130_v5, %v1129_v1 }
 0x135   :  { %v812_v9 = vadd.f32 %v792_v6, %v346_v3  ;;  %v795_v10 = vadd.f32 %v1131_v7, %v1067_v4 }
 0x137   :  { %829 = vst.msk [vmem:[%s1589_s2 + $0x70] sm:$0xff] %vm57_vm0, %v812_v9  ;;  %v813_v11 = vadd.f32 %v795_v10, %v347_v8 }
 0x139   :  { %830 = vst.msk [vmem:[%s1589_s2 + $0x78] sm:$0xff] %vm57_vm0, %v813_v11 }

</bundles_post_ra>
